<compile_context>
chip_gen: v7x
topology: tpu7x:2x2x1
jax: 0.10.0
libtpu: 0.0.40
codegen_flags: <defaults>
</compile_context>

<pallas_src>
import jax
import jax.numpy as jnp
from jax.experimental import pallas as pl
from jax.experimental.pallas import tpu as pltpu


def _dy_nconv_kernel(x_ref, a_ref, o_ref):
    # x_ref: (TN, TL, C, V), a_ref: (TN, TL, V, W), o_ref: (TN, TL, C, W)
    tn, tl, C, V = x_ref.shape
    W = a_ref.shape[-1]
    b = tn * tl

    # Collapse the leading (batch) dims -- layout-free reshape (last two dims
    # untouched) -- and run one batched MXU matmul with f32 accumulation.
    x = x_ref[...].reshape(b, C, V)
    a = a_ref[...].reshape(b, V, W)
    o = jnp.einsum(
        "bcv,bvw->bcw", x, a, preferred_element_type=jnp.float32
    )  # (b, C, W)
    o_ref[...] = o.reshape(tn, tl, C, W).astype(o_ref.dtype)


def _round_up(a, b):
    return ((a + b - 1) // b) * b


def _largest_divisor_leq(n, cap):
    cap = max(1, min(n, cap))
    for d in range(cap, 0, -1):
        if n % d == 0:
            return d
    return 1


def _vmem_budget():
    """Generation-aware VMEM numbers (v7x: 64 MiB/TC, v5e/v6e: 128 MiB)."""
    try:
        vmem_cap = int(
            getattr(pltpu.get_tpu_info(), "vmem_capacity_bytes", 64 * 1024 * 1024)
        )
    except Exception:  # not on TPU / query unavailable -> conservative default
        vmem_cap = 64 * 1024 * 1024
    # v7x -> 48 MiB limit, v5e/v6e -> 96 MiB limit.
    vmem_limit = min(vmem_cap * 3 // 4, 100 * 1024 * 1024)
    # One buffer set per step; Pallas double-buffers on top, keep headroom.
    per_step_budget = vmem_limit // 4
    return vmem_limit, per_step_budget


def dy_nconv_nlcv(
    x_nlcv,
    a_nlvw,
    *,
    out_dtype=None,
    min_step_bytes=2 * 1024 * 1024,
    target_steps=8,
):
    """Transpose-free core: x (N, L, C, V), A (N, L, V, W) -> out (N, L, C, W)."""
    N, L, C, V = x_nlcv.shape
    Na, La, Va, W = a_nlvw.shape
    assert N == Na and L == La and V == Va
    if out_dtype is None:
        out_dtype = x_nlcv.dtype

    in_itemsize = jnp.dtype(x_nlcv.dtype).itemsize
    out_itemsize = jnp.dtype(out_dtype).itemsize

    vmem_limit, budget = _vmem_budget()

    # Physically padded per-(n, l) VMEM footprint: sublane multiple on the
    # second-minor dim (8 for f32, 16 for bf16), lane multiple of 128 on the
    # minor dim.  Small/odd C, V, W can otherwise inflate the real footprint
    # far past the naive estimate (worst on v7x's 64 MiB VMEM).
    sub_in = 8 * 4 // in_itemsize
    sub_out = 8 * 4 // out_itemsize
    per_sample = (
        _round_up(C, sub_in) * _round_up(V, 128) * in_itemsize
        + _round_up(V, sub_in) * _round_up(W, 128) * in_itemsize
        + _round_up(C, sub_out) * _round_up(W, 128) * out_itemsize
    )

    # Batch as many (n, l) matmuls per step as fit the VMEM budget, but also
    # keep >= ~target_steps grid steps (pipeline depth / 2-TC sharding on v7x)
    # as long as each step still moves >= min_step_bytes of padded data
    # (extra steps on single-TC v5e/v6e cost only ~0.35 us each at that size).
    cap_vmem = max(1, budget // per_sample)
    cap_steps = max(1, -(-(N * L) // target_steps))
    floor_bytes = max(1, min_step_bytes // per_sample)
    max_batch = min(cap_vmem, max(cap_steps, floor_bytes))

    TL = _largest_divisor_leq(L, max_batch)
    TN = _largest_divisor_leq(N, max(1, max_batch // TL))
    grid = (N // TN, L // TL)

    cost = pl.CostEstimate(
        flops=2 * N * C * V * W * L,
        transcendentals=0,
        bytes_accessed=(N * C * V * L + N * V * W * L) * in_itemsize
        + N * C * W * L * out_itemsize,
    )

    # NOTE: block last two dims equal the full C/V/W extents, so the (8,128)
    # divisibility rule is satisfied even for small / odd channel, node counts.
    return pl.pallas_call(
        _dy_nconv_kernel,
        out_shape=jax.ShapeDtypeStruct((N, L, C, W), out_dtype),
        grid_spec=pltpu.PrefetchScalarGridSpec(
            num_scalar_prefetch=0,
            grid=grid,
            in_specs=[
                pl.BlockSpec((TN, TL, C, V), lambda i, j: (i, j, 0, 0)),
                pl.BlockSpec((TN, TL, V, W), lambda i, j: (i, j, 0, 0)),
            ],
            out_specs=pl.BlockSpec((TN, TL, C, W), lambda i, j: (i, j, 0, 0)),
        ),
        compiler_params=pltpu.CompilerParams(
            dimension_semantics=("parallel", "parallel"),
            vmem_limit_bytes=vmem_limit,
            # Let XLA fuse the (cheap, layout-only) producers of both inputs
            # into the Pallas block loads instead of materializing transposed
            # copies in HBM -- the op is bandwidth-bound, so this is the
            # single largest lever.
            allow_input_fusion=[True, True],
        ),
        cost_estimate=cost,
    )(x_nlcv, a_nlvw)


def dy_nconv(x, A, *, compute_dtype=None):
    """x: (N, C, V, L), A: (N, V, W, L) -> (N, C, W, L)  (torch.einsum semantics)."""
    N, C, V, L = x.shape
    Na, Va, W, La = A.shape
    assert N == Na and V == Va and L == La

    # Result dtype follows the original inputs even if a reduced compute dtype
    # (e.g. bf16) is requested; MXU accumulation is f32 either way.
    result_dtype = jnp.result_type(x.dtype, A.dtype)
    if compute_dtype is not None:
        x = x.astype(compute_dtype)
        A = A.astype(compute_dtype)

    # (N, L, C, V) / (N, L, V, W): with allow_input_fusion these transposes are
    # fused into the Pallas loads rather than round-tripping through HBM.
    x_t = jnp.transpose(x, (0, 3, 1, 2))
    a_t = jnp.transpose(A, (0, 3, 1, 2))

    out_t = dy_nconv_nlcv(x_t, a_t, out_dtype=result_dtype)

    # Back to the PyTorch output layout (N, C, W, L); .contiguous() is a no-op
    # in JAX.
    # TODO(synk): keep the model in (N, L, C, W) layout to drop this last
    # HBM round-trip entirely (use dy_nconv_nlcv directly).
    return jnp.transpose(out_t, (0, 2, 3, 1))


if __name__ == "__main__":
    key = jax.random.PRNGKey(0)
    kx, ka = jax.random.split(key)

    N, C, V, W, L = 2, 4, 16, 16, 8
    x = jax.random.normal(kx, (N, C, V, L), dtype=jnp.float32)
    A = jax.random.normal(ka, (N, V, W, L), dtype=jnp.float32)

    dy_nconv_fn = jax.jit(dy_nconv)
    out = jax.block_until_ready(dy_nconv_fn(x, A))

    ref = jnp.einsum("ncvl,nvwl->ncwl", x, A)
    assert out.shape == (N, C, W, L)
    assert out.dtype == jnp.float32
    assert jnp.allclose(out, ref, atol=1e-5, rtol=1e-5)

    print("KERNEL_OK")
</pallas_src>

<mosaic_0001>
module attributes {stable_mosaic.version = 11 : i64} {
  func.func @_dy_nconv_kernel(%arg0: i32, %arg1: i32, %arg2: memref<2x8x4x16xf32, #tpu.memory_space<vmem>>, %arg3: memref<2x8x16x16xf32, #tpu.memory_space<vmem>>, %arg4: memref<2x8x4x16xf32, #tpu.memory_space<vmem>>) attributes {dimension_semantics = [#tpu.dimension_semantics<parallel>, #tpu.dimension_semantics<parallel>], iteration_bounds = array<i64: 1, 1>, scalar_prefetch = 0 : i64, scratch_operands = 0 : i64, tpu.core_type = #tpu.core_type<tc>, window_params = [{transform_indices = @transform_0, window_bounds = array<i64: 2, 8, 4, 16>}, {transform_indices = @transform_1, window_bounds = array<i64: 2, 8, 16, 16>}, {transform_indices = @transform_2, window_bounds = array<i64: 2, 8, 4, 16>}]} {
    %c0 = arith.constant 0 : index
    %c0_0 = arith.constant 0 : index
    %c0_1 = arith.constant 0 : index
    %c0_2 = arith.constant 0 : index
    %0 = vector.load %arg2[%c0, %c0_0, %c0_1, %c0_2] : memref<2x8x4x16xf32, #tpu.memory_space<vmem>>, vector<2x8x4x16xf32>
    %1 = vector.shape_cast %0 : vector<2x8x4x16xf32> to vector<16x4x16xf32>
    %c0_3 = arith.constant 0 : index
    %c0_4 = arith.constant 0 : index
    %c0_5 = arith.constant 0 : index
    %c0_6 = arith.constant 0 : index
    %2 = vector.load %arg3[%c0_3, %c0_4, %c0_5, %c0_6] : memref<2x8x16x16xf32, #tpu.memory_space<vmem>>, vector<2x8x16x16xf32>
    %3 = vector.shape_cast %2 : vector<2x8x16x16xf32> to vector<16x16x16xf32>
    "tpu.trace_start"() <{level = 10 : i32, message = "bcv,bvw->bcw"}> : () -> ()
    %cst = arith.constant dense<0.000000e+00> : vector<16x4x16xf32>
    %4 = tpu.matmul %1, %3, %cst {dimension_numbers = #tpu.dot_dimension_numbers<[2], [1], [1], [2], [0, 0, 0, 1, 1, 2], [0], [0]>} : vector<16x4x16xf32>, vector<16x16x16xf32>, vector<16x4x16xf32> -> vector<16x4x16xf32>
    "tpu.trace_stop"() : () -> ()
    %5 = vector.shape_cast %4 : vector<16x4x16xf32> to vector<2x8x4x16xf32>
    %c0_7 = arith.constant 0 : index
    %c0_8 = arith.constant 0 : index
    %c0_9 = arith.constant 0 : index
    %c0_10 = arith.constant 0 : index
    %6 = vector.load %arg4[%c0_7, %c0_8, %c0_9, %c0_10] : memref<2x8x4x16xf32, #tpu.memory_space<vmem>>, vector<2x8x4x16xf32>
    tpu.vector_store %arg4[%c0_7, %c0_8, %c0_9, %c0_10], %5 {strides = array<i32>} : memref<2x8x4x16xf32, #tpu.memory_space<vmem>>, vector<2x8x4x16xf32>,
    return
  }
  func.func @transform_0(%arg0: i32, %arg1: i32) -> (i32, i32, i32, i32) {
    %c0_i32 = arith.constant 0 : i32
    %c0_i32_0 = arith.constant 0 : i32
    %c0_i32_1 = arith.constant 0 : i32
    return %arg0, %arg1, %c0_i32, %c0_i32_0 : i32, i32, i32, i32
  }
  func.func @transform_1(%arg0: i32, %arg1: i32) -> (i32, i32, i32, i32) {
    %c0_i32 = arith.constant 0 : i32
    %c0_i32_0 = arith.constant 0 : i32
    %c0_i32_1 = arith.constant 0 : i32
    return %arg0, %arg1, %c0_i32, %c0_i32_0 : i32, i32, i32, i32
  }
  func.func @transform_2(%arg0: i32, %arg1: i32) -> (i32, i32, i32, i32) {
    %c0_i32 = arith.constant 0 : i32
    %c0_i32_0 = arith.constant 0 : i32
    %c0_i32_1 = arith.constant 0 : i32
    return %arg0, %arg1, %c0_i32, %c0_i32_0 : i32, i32, i32, i32
  }
}

</mosaic_0001>

<bundles_post_ra>
// kernel: dy_nconv.2
= control target key start
LH: loop header
LB: loop body
LE: loop exit
PB: predicated region body
PF: predicated region fallthrough
CT: control target
= control target key end

     0   :  { %v1758_v3 = vmov 0.0|0.0   ;;  %vm1759_vm0 = vmmov 0   ;;  %v1760_v8 = vmov 0.0   ;;  %vm295_vm1 = vcmask 130048   ;;  %s2024_s0 = inlined_call_operand.vmem [shape: f32[2,16,16,8], index: 0, kind: input, shape index: {}]   ;;  %s2025_s1 = inlined_call_operand.vmem [shape: f32[2,4,16,8], index: 1, kind: input, shape index: {}]   ;;  %s2026_s2 = inlined_call_operand.vmem [shape: f32[2,8,4,16], index: 2, kind: output, shape index: {}]  }
   0x1   :  { %v89_v0 = vld [vmem:[%s2024_s0] sm:$0xff]  ;;  %v1500_v1 = vld [vmem:[%s2024_s0 + $0x8] sm:$0xff]  ;;  %v1501_v2 = vld [vmem:[%s2024_s0 + $0x10] sm:$0xff]  ;;  %1707 = vmatprep.subr.bf16.mxu0 %v1758_v3  ;;  %1710 = vmatprep.subr.bf16.mxu1 %v1758_v3  ;;  %vm1464_vm2 = vcmask 125952  }
   0x2   :  { %v1708_v4 = vpack.c.bf16 %v1500_v1, %v89_v0  ;;  %v1502_v5 = vld [vmem:[%s2024_s0 + $0x18] sm:$0xff]  ;;  %v11_v6 = vld [vmem:[%s2025_s1] sm:$0xff]   ;;  %1599 = vmatprep.mubr.msk.f32.mxu0 %vm1759_vm0, %v1760_v8  ;;  %1606 = vmatprep.mubr.msk.f32.mxu1 %vm1759_vm0, %v1760_v8  ;;  %v1504_v10 = vld [vmem:[%s2024_s0 + $0x28] sm:$0xff] }
   0x3   :  { %v1711_v7 = vpack.c.bf16 %v1502_v5, %v1501_v2  ;;  %13 = vst [vmem:[#allocation2] sm:$0xff] %v11_v6   ;;  %v1503_v9 = vld [vmem:[%s2024_s0 + $0x20] sm:$0xff]  ;;  %v1486_v11 = vld [vmem:[%s2025_s1 + $0x8] sm:$0xff]   ;;  %v1505_v12 = vld [vmem:[%s2024_s0 + $0x30] sm:$0xff] }
   0x4   :  { %1709 = vmatpush3.bf16.msra.mxu0 %v1708_v4  ;;  %v1506_v13 = vld [vmem:[%s2024_s0 + $0x38] sm:$0xff]  ;;  %23 = vst [vmem:[#allocation2 + $0x8] sm:$0xff] %v1486_v11   ;;  %v1488_v14 = vld [vmem:[%s2025_s1 + $0x10] sm:$0xff]   ;;  %v1714_v16 = vpack.c.bf16 %v1504_v10, %v1503_v9  ;;  %v1507_v18 = vld [vmem:[%s2024_s0 + $0x40] sm:$0xff] }
   0x5   :  { %1712 = vmatpush3.bf16.msra.mxu1 %v1711_v7  ;;  %1713 = vmatprep.subr.bf16.mxu0 %v1758_v3  ;;  %33 = vst [vmem:[#allocation2 + $0x10] sm:$0xff] %v1488_v14   ;;  %v1490_v15 = vld [vmem:[%s2025_s1 + $0x18] sm:$0xff]   ;;  %v1717_v17 = vpack.c.bf16 %v1506_v13, %v1505_v12  ;;  %v1508_v19 = vld [vmem:[%s2024_s0 + $0x48] sm:$0xff]  ;;  %v1509_v20 = vld [vmem:[%s2024_s0 + $0x50] sm:$0xff] }
   0x6   :  { %1716 = vmatprep.subr.bf16.mxu1 %v1758_v3  ;;  %43 = vst [vmem:[#allocation2 + $0x18] sm:$0xff] %v1490_v15   ;;  %v1510_v21 = vld [vmem:[%s2024_s0 + $0x58] sm:$0xff]  ;;  %v1492_v22 = vld [vmem:[%s2025_s1 + $0x20] sm:$0xff]   ;;  %v1494_v25 = vld [vmem:[%s2025_s1 + $0x28] sm:$0xff]   ;;  %v1720_v28 = vpack.c.bf16 %v1508_v19, %v1507_v18 }
   0x7   :  { %53 = vst [vmem:[#allocation2 + $0x20] sm:$0xff] %v1492_v22   ;;  %v1723_v29 = vpack.c.bf16 %v1510_v21, %v1509_v20  ;;  %v1511_v30 = vld [vmem:[%s2024_s0 + $0x60] sm:$0xff]  ;;  %63 = vst [vmem:[#allocation2 + $0x28] sm:$0xff] %v1494_v25   ;;  %v1512_v31 = vld [vmem:[%s2024_s0 + $0x68] sm:$0xff] }
   0x8   :  { %v1513_v32 = vld [vmem:[%s2024_s0 + $0x70] sm:$0xff]  ;;  %v1514_v33 = vld [vmem:[%s2024_s0 + $0x78] sm:$0xff]  ;;  %v1515_v35 = vld [vmem:[%s2024_s0 + $0x80] sm:$0xff]  ;;  %v1726_v38 = vpack.c.bf16 %v1512_v31, %v1511_v30 }
   0x9   :  { %v1496_v34 = vld [vmem:[%s2025_s1 + $0x30] sm:$0xff]   ;;  %v1729_v39 = vpack.c.bf16 %v1514_v33, %v1513_v32  ;;  %v1498_v40 = vld [vmem:[%s2025_s1 + $0x38] sm:$0xff]   ;;  %v1516_v41 = vld [vmem:[%s2024_s0 + $0x88] sm:$0xff] }
   0xa   :  { %v247_v23 = vld [vmem:[#allocation2] sm:$0xf]  ;;  %v248_v24 = vld [vmem:[#allocation2 + $0x4] sm:$0xf]  ;;  %73 = vst [vmem:[#allocation2 + $0x30] sm:$0xff] %v1496_v34   ;;  %v1517_v42 = vld [vmem:[%s2024_s0 + $0x90] sm:$0xff]  ;;  %v1732_v46 = vpack.c.bf16 %v1516_v41, %v1515_v35 }
   0xb   :  { %1600 = vmatmul.mubr.msk.f32.vlgmr.msra.gmra.mrb[0].mxu0 %vm295_vm1, %v247_v23  ;;  %1607 = vmatmul.mubr.msk.f32.vlgmr.msra.gmra.mrb[0].mxu1 %vm295_vm1, %v248_v24  ;;  %v249_v26 = vld [vmem:[#allocation2 + $0x8] sm:$0xf]  ;;  %v250_v27 = vld [vmem:[#allocation2 + $0xc] sm:$0xf]  ;;  %v1518_v43 = vld [vmem:[%s2024_s0 + $0x98] sm:$0xff]  ;;  %83 = vst [vmem:[#allocation2 + $0x38] sm:$0xff] %v1498_v40  }
   0xc   :  { %1715 = vmatpush3.bf16.msra.mxu0 %v1714_v16  ;;  %1718 = vmatpush3.bf16.msra.mxu1 %v1717_v17  ;;  %v251_v36 = vld [vmem:[#allocation2 + $0x10] sm:$0xf]  ;;  %v252_v37 = vld [vmem:[#allocation2 + $0x14] sm:$0xf]  ;;  %v1735_v47 = vpack.c.bf16 %v1518_v43, %v1517_v42  ;;  %v1519_v48 = vld [vmem:[%s2024_s0 + $0xa0] sm:$0xff] }
   0xd   :  { %1613 = vmatprep.mubr.msk.f32.mxu0 %vm1759_vm0, %v1760_v8  ;;  %1620 = vmatprep.mubr.msk.f32.mxu1 %vm1759_vm0, %v1760_v8  ;;  %v253_v44 = vld [vmem:[#allocation2 + $0x18] sm:$0xf]  ;;  %v254_v45 = vld [vmem:[#allocation2 + $0x1c] sm:$0xf]  ;;  %v1520_v49 = vld [vmem:[%s2024_s0 + $0xa8] sm:$0xff] }
   0xe   :  { %1719 = vmatprep.subr.bf16.mxu0 %v1758_v3  ;;  %1722 = vmatprep.subr.bf16.mxu1 %v1758_v3  ;;  %v1521_v50 = vld [vmem:[%s2024_s0 + $0xb0] sm:$0xff]  ;;  %v1522_v51 = vld [vmem:[%s2024_s0 + $0xb8] sm:$0xff]  ;;  %v255_v52 = vld [vmem:[#allocation2 + $0x20] sm:$0xf]  ;;  %v1738_v54 = vpack.c.bf16 %v1520_v49, %v1519_v48 }
   0xf   :  { %1614 = vmatmul.mubr.msk.f32.vlgmr.msra.gmra.mrb[2].mxu0 %vm295_vm1, %v249_v26  ;;  %1621 = vmatmul.mubr.msk.f32.vlgmr.msra.gmra.mrb[2].mxu1 %vm295_vm1, %v250_v27  ;;  %v256_v53 = vld [vmem:[#allocation2 + $0x24] sm:$0xf]  ;;  %v1741_v55 = vpack.c.bf16 %v1522_v51, %v1521_v50  ;;  %v1524_v57 = vld [vmem:[%s2024_s0 + $0xc8] sm:$0xff]  ;;  %v1525_v58 = vld [vmem:[%s2024_s0 + $0xd0] sm:$0xff] }
  0x10   :  { %1721 = vmatpush3.bf16.msra.mxu0 %v1720_v28  ;;  %1724 = vmatpush3.bf16.msra.mxu1 %v1723_v29  ;;  %v1523_v56 = vld [vmem:[%s2024_s0 + $0xc0] sm:$0xff]  ;;  %v1526_v59 = vld [vmem:[%s2024_s0 + $0xd8] sm:$0xff]  ;;  %v257_v60 = vld [vmem:[#allocation2 + $0x28] sm:$0xf] }
  0x11   :  { %1627 = vmatprep.mubr.msk.f32.mxu0 %vm1759_vm0, %v1760_v8  ;;  %1634 = vmatprep.mubr.msk.f32.mxu1 %vm1759_vm0, %v1760_v8  ;;  %v258_v61 = vld [vmem:[#allocation2 + $0x2c] sm:$0xf]  ;;  %v1744_v62 = vpack.c.bf16 %v1524_v57, %v1523_v56  ;;  %v1747_v63 = vpack.c.bf16 %v1526_v59, %v1525_v58  ;;  %v1527_v0 = vld [vmem:[%s2024_s0 + $0xe0] sm:$0xff]  ;;  %v1529_v2 = vld [vmem:[%s2024_s0 + $0xf0] sm:$0xff] }
  0x12   :  { %1725 = vmatprep.subr.bf16.mxu0 %v1758_v3  ;;  %1728 = vmatprep.subr.bf16.mxu1 %v1758_v3  ;;  %v1528_v1 = vld [vmem:[%s2024_s0 + $0xe8] sm:$0xff]  ;;  %v1530_v4 = vld [vmem:[%s2024_s0 + $0xf8] sm:$0xff]  ;;  %v259_v5 = vld [vmem:[#allocation2 + $0x30] sm:$0xf] }
  0x13   :  { %1628 = vmatmul.mubr.msk.f32.vlgmr.msra.gmra.mrb[4].mxu0 %vm295_vm1, %v251_v36  ;;  %1635 = vmatmul.mubr.msk.f32.vlgmr.msra.gmra.mrb[4].mxu1 %vm295_vm1, %v252_v37  ;;  %v260_v6 = vld [vmem:[#allocation2 + $0x34] sm:$0xf]  ;;  %v1750_v7 = vpack.c.bf16 %v1528_v1, %v1527_v0  ;;  %v1753_v9 = vpack.c.bf16 %v1530_v4, %v1529_v2  ;;  %v261_v10 = vld [vmem:[#allocation2 + $0x38] sm:$0xf]  ;;  %v262_v11 = vld [vmem:[#allocation2 + $0x3c] sm:$0xf] }
  0x14   :  { %1727 = vmatpush3.bf16.msra.mxu0 %v1726_v38  ;;  %1730 = vmatpush3.bf16.msra.mxu1 %v1729_v39 }
  0x15   :  { %1641 = vmatprep.mubr.msk.f32.mxu0 %vm1759_vm0, %v1760_v8  ;;  %1648 = vmatprep.mubr.msk.f32.mxu1 %vm1759_vm0, %v1760_v8 }
  0x16   :  { %1731 = vmatprep.subr.bf16.mxu0 %v1758_v3  ;;  %1734 = vmatprep.subr.bf16.mxu1 %v1758_v3 }
  0x17   :  { %1642 = vmatmul.mubr.msk.f32.vlgmr.msra.gmra.mrb[6].mxu0 %vm295_vm1, %v253_v44  ;;  %1649 = vmatmul.mubr.msk.f32.vlgmr.msra.gmra.mrb[6].mxu1 %vm295_vm1, %v254_v45 }
  0x18   :  { %1733 = vmatpush3.bf16.msra.mxu0 %v1732_v46  ;;  %1736 = vmatpush3.bf16.msra.mxu1 %v1735_v47 }
  0x19   :  { %1655 = vmatprep.mubr.msk.f32.mxu0 %vm1759_vm0, %v1760_v8  ;;  %1662 = vmatprep.mubr.msk.f32.mxu1 %vm1759_vm0, %v1760_v8 }
  0x1a   :  { %1737 = vmatprep.subr.bf16.mxu0 %v1758_v3  ;;  %1740 = vmatprep.subr.bf16.mxu1 %v1758_v3 }
  0x1b   :  { %1656 = vmatmul.mubr.msk.f32.vlgmr.msra.gmra.mrb[8].mxu0 %vm295_vm1, %v255_v52  ;;  %1663 = vmatmul.mubr.msk.f32.vlgmr.msra.gmra.mrb[8].mxu1 %vm295_vm1, %v256_v53 }
  0x1c   :  { %1739 = vmatpush3.bf16.msra.mxu0 %v1738_v54  ;;  %1742 = vmatpush3.bf16.msra.mxu1 %v1741_v55 }
  0x1d   :  { %1669 = vmatprep.mubr.msk.f32.mxu0 %vm1759_vm0, %v1760_v8  ;;  %1676 = vmatprep.mubr.msk.f32.mxu1 %vm1759_vm0, %v1760_v8 }
  0x1e   :  { %1743 = vmatprep.subr.bf16.mxu0 %v1758_v3  ;;  %1746 = vmatprep.subr.bf16.mxu1 %v1758_v3 }
  0x1f   :  { %1670 = vmatmul.mubr.msk.f32.vlgmr.msra.gmra.mrb[10].mxu0 %vm295_vm1, %v257_v60  ;;  %1677 = vmatmul.mubr.msk.f32.vlgmr.msra.gmra.mrb[10].mxu1 %vm295_vm1, %v258_v61 }
  0x20   :  { %1745 = vmatpush3.bf16.msra.mxu0 %v1744_v62  ;;  %1748 = vmatpush3.bf16.msra.mxu1 %v1747_v63 }
  0x21   :  { %1683 = vmatprep.mubr.msk.f32.mxu0 %vm1759_vm0, %v1760_v8  ;;  %1690 = vmatprep.mubr.msk.f32.mxu1 %vm1759_vm0, %v1760_v8 }
  0x22   :  { %1749 = vmatprep.subr.bf16.mxu0 %v1758_v3  ;;  %1752 = vmatprep.subr.bf16.mxu1 %v1758_v3 }
  0x23   :  { %1684 = vmatmul.mubr.msk.f32.vlgmr.msra.gmra.mrb[12].mxu0 %vm295_vm1, %v259_v5  ;;  %1691 = vmatmul.mubr.msk.f32.vlgmr.msra.gmra.mrb[12].mxu1 %vm295_vm1, %v260_v6 }
  0x24   :  { %1751 = vmatpush3.bf16.msra.mxu0 %v1750_v7  ;;  %1754 = vmatpush3.bf16.msra.mxu1 %v1753_v9 }
  0x25   :  { %1697 = vmatprep.mubr.msk.f32.mxu0 %vm1759_vm0, %v1760_v8  ;;  %1704 = vmatprep.mubr.msk.f32.mxu1 %vm1759_vm0, %v1760_v8 }
  0x27   :  { %1698 = vmatmul.mubr.msk.f32.vlgmr.msra.gmra.mrb[14].mxu0 %vm295_vm1, %v261_v10  ;;  %1705 = vmatmul.mubr.msk.f32.vlgmr.msra.gmra.mrb[14].mxu1 %vm295_vm1, %v262_v11 }
  0xde   :  { %v365_v3 = vpop.f32.mrb[0].mxu0  ;;  %v438_v12 = vpop.f32.mrb[0].mxu1 }
  0xdf   :  { %1465 = vst.msk [vmem:[%s2026_s2] sm:$0xf] %vm1464_vm2, %v365_v3  ;;  %1466 = vst.msk [vmem:[%s2026_s2 + $0x4] sm:$0xf] %vm1464_vm2, %v438_v12  ;;  %v1601_v13 = vpop.f32.mrb[1].mxu0  ;;  %v1608_v14 = vpop.f32.mrb[1].mxu1 }
  0xe2   :  { %v511_v8 = vpop.f32.mrb[2].mxu0  ;;  %v584_v15 = vpop.f32.mrb[2].mxu1 }
  0xe3   :  { %1467 = vst.msk [vmem:[%s2026_s2 + $0x8] sm:$0xf] %vm1464_vm2, %v511_v8  ;;  %1468 = vst.msk [vmem:[%s2026_s2 + $0xc] sm:$0xf] %vm1464_vm2, %v584_v15  ;;  %v1615_v16 = vpop.f32.mrb[3].mxu0  ;;  %v1622_v17 = vpop.f32.mrb[3].mxu1 }
  0xe6   :  { %v657_v18 = vpop.f32.mrb[4].mxu0  ;;  %v730_v19 = vpop.f32.mrb[4].mxu1 }
  0xe7   :  { %1469 = vst.msk [vmem:[%s2026_s2 + $0x10] sm:$0xf] %vm1464_vm2, %v657_v18  ;;  %1470 = vst.msk [vmem:[%s2026_s2 + $0x14] sm:$0xf] %vm1464_vm2, %v730_v19  ;;  %v1629_v20 = vpop.f32.mrb[5].mxu0  ;;  %v1636_v21 = vpop.f32.mrb[5].mxu1 }
  0xea   :  { %v803_v22 = vpop.f32.mrb[6].mxu0  ;;  %v876_v23 = vpop.f32.mrb[6].mxu1 }
  0xeb   :  { %1471 = vst.msk [vmem:[%s2026_s2 + $0x18] sm:$0xf] %vm1464_vm2, %v803_v22  ;;  %1472 = vst.msk [vmem:[%s2026_s2 + $0x1c] sm:$0xf] %vm1464_vm2, %v876_v23  ;;  %v1643_v24 = vpop.f32.mrb[7].mxu0  ;;  %v1650_v25 = vpop.f32.mrb[7].mxu1 }
  0xee   :  { %v949_v26 = vpop.f32.mrb[8].mxu0  ;;  %v1022_v27 = vpop.f32.mrb[8].mxu1 }
  0xef   :  { %1473 = vst.msk [vmem:[%s2026_s2 + $0x20] sm:$0xf] %vm1464_vm2, %v949_v26  ;;  %1474 = vst.msk [vmem:[%s2026_s2 + $0x24] sm:$0xf] %vm1464_vm2, %v1022_v27  ;;  %v1657_v28 = vpop.f32.mrb[9].mxu0  ;;  %v1664_v29 = vpop.f32.mrb[9].mxu1 }
  0xf2   :  { %v1095_v30 = vpop.f32.mrb[10].mxu0  ;;  %v1168_v31 = vpop.f32.mrb[10].mxu1 }
  0xf3   :  { %1475 = vst.msk [vmem:[%s2026_s2 + $0x28] sm:$0xf] %vm1464_vm2, %v1095_v30  ;;  %1476 = vst.msk [vmem:[%s2026_s2 + $0x2c] sm:$0xf] %vm1464_vm2, %v1168_v31  ;;  %v1671_v32 = vpop.f32.mrb[11].mxu0  ;;  %v1678_v33 = vpop.f32.mrb[11].mxu1 }
  0xf6   :  { %v1241_v34 = vpop.f32.mrb[12].mxu0  ;;  %v1314_v35 = vpop.f32.mrb[12].mxu1 }
  0xf7   :  { %1477 = vst.msk [vmem:[%s2026_s2 + $0x30] sm:$0xf] %vm1464_vm2, %v1241_v34  ;;  %1478 = vst.msk [vmem:[%s2026_s2 + $0x34] sm:$0xf] %vm1464_vm2, %v1314_v35  ;;  %v1685_v36 = vpop.f32.mrb[13].mxu0  ;;  %v1692_v37 = vpop.f32.mrb[13].mxu1 }
  0xfa   :  { %v1387_v38 = vpop.f32.mrb[14].mxu0  ;;  %v1460_v39 = vpop.f32.mrb[14].mxu1 }
  0xfb   :  { %1479 = vst.msk [vmem:[%s2026_s2 + $0x38] sm:$0xf] %vm1464_vm2, %v1387_v38  ;;  %1480 = vst.msk [vmem:[%s2026_s2 + $0x3c] sm:$0xf] %vm1464_vm2, %v1460_v39  ;;  %v1699_v40 = vpop.f32.mrb[15].mxu0  ;;  %v1706_v41 = vpop.f32.mrb[15].mxu1 }

</bundles_post_ra>
